<compile_context>
chip_gen: v6e
topology: v6e:2x2x1
jax: 0.10.0
libtpu: 0.0.40
codegen_flags: <defaults>
</compile_context>

<pallas_src>
import functools

import jax
import jax.numpy as jnp
from jax.experimental import pallas as pl
from jax.experimental.pallas import tpu as pltpu


_VMEM_LIMIT_BYTES = 32 * 1024 * 1024  # <= scoped/physical VMEM on v5e/v6e/v7x


def _pick_divisor_tile(n, candidates):
    """Largest candidate that evenly divides n, else n itself (full extent)."""
    for c in candidates:
        if c <= n and n % c == 0:
            return c
    return n


def _pick_row_tile(rows, width_elems, budget_bytes=12 * 1024 * 1024):
    """Row tile (multiple of 8 dividing `rows`, or full) under a VMEM budget.

    Budget model: ~3 f32 arrays of (rows_tile, width_elems), double-buffered.
    """
    max_rows = max(8, budget_bytes // (6 * 4 * max(width_elems, 1)))
    if rows <= max_rows:
        return rows
    t = (max_rows // 8) * 8
    while t >= 8:
        if rows % t == 0:
            return t
        t -= 8
    return rows  # fallback: single block over rows


# ----------------------------------------------------------------------------
# Kernel 1: 1x1 Conv1d (bias=False) in NCW, lane-dense over the time axis.
# ----------------------------------------------------------------------------
def _bn_conv1x1_kernel(x_ref, w_ref, o_ref):
    # x_ref: (1, Cin, TL), w_ref: (Cout, Cin), o_ref: (1, Cout, TL)
    # With Cin/Cout << 128 this is HBM-bound, not MXU-bound; the MXU matmul is kept
    # for simplicity (a VPU FMA loop over Cin would hit the same HBM roofline).
    o_ref[0] = jnp.dot(
        w_ref[...], x_ref[0], preferred_element_type=jnp.float32
    ).astype(o_ref.dtype)


def _pallas_bn_ncw(x, w):
    """x: (B, Cin, L) NCW, w: (Cout, Cin) -> (B, Cout, L) NCW."""
    B, Cin, L = x.shape
    Cout = w.shape[0]
    TL = _pick_divisor_tile(L, (512, 256, 128))  # multiple of 128 or the full L
    grid = (B, L // TL)
    cost = pl.CostEstimate(
        flops=2 * B * L * Cin * Cout,
        transcendentals=0,
        bytes_accessed=4 * (B * Cin * L + Cin * Cout + B * Cout * L),
    )
    return pl.pallas_call(
        _bn_conv1x1_kernel,
        out_shape=jax.ShapeDtypeStruct((B, Cout, L), jnp.float32),
        grid=grid,
        in_specs=[
            pl.BlockSpec((1, Cin, TL), lambda b, l: (b, 0, l)),
            pl.BlockSpec((Cout, Cin), lambda b, l: (0, 0)),
        ],
        out_specs=pl.BlockSpec((1, Cout, TL), lambda b, l: (b, 0, l)),
        compiler_params=pltpu.CompilerParams(
            dimension_semantics=("parallel", "parallel"),
            vmem_limit_bytes=_VMEM_LIMIT_BYTES,
        ),
        cost_estimate=cost,
    )(x, w)


# ----------------------------------------------------------------------------
# Kernel 2: fused overlap-add for merge_feature.
#   out[:, t] = even_stream[:, t + stride] + odd_stream[:, t],  t in [0, out_len)
# (the half-segment shift and the trailing `rest` crop are folded into the kernel).
# ----------------------------------------------------------------------------
def _overlap_add_kernel(even_ref, odd_ref, out_ref, *, stride):
    # even_ref/odd_ref: (TR, full_len); out_ref: (TR, out_len)
    out_len = out_ref.shape[-1]
    in1 = even_ref[:, stride:stride + out_len]  # shifted even-segment stream
    in2 = odd_ref[:, :out_len]                  # odd-segment stream
    out_ref[...] = in1 + in2


def _pallas_overlap_add(even_stream, odd_stream, *, stride, out_len):
    R, full_len = even_stream.shape
    TR = _pick_row_tile(R, full_len)
    grid = (R // TR,)
    cost = pl.CostEstimate(
        flops=R * out_len,
        transcendentals=0,
        bytes_accessed=4 * (2 * R * full_len + R * out_len),
    )
    kernel = functools.partial(_overlap_add_kernel, stride=stride)
    return pl.pallas_call(
        kernel,
        out_shape=jax.ShapeDtypeStruct((R, out_len), jnp.float32),
        grid=grid,
        in_specs=[
            pl.BlockSpec((TR, full_len), lambda i: (i, 0)),
            pl.BlockSpec((TR, full_len), lambda i: (i, 0)),
        ],
        out_specs=pl.BlockSpec((TR, out_len), lambda i: (i, 0)),
        compiler_params=pltpu.CompilerParams(
            dimension_semantics=("parallel",),
            vmem_limit_bytes=_VMEM_LIMIT_BYTES,
        ),
        cost_estimate=cost,
    )(even_stream, odd_stream)


# ----------------------------------------------------------------------------
# DPRNN_base in JAX (glue = reshapes / padding; compute = Pallas kernels above)
# ----------------------------------------------------------------------------
class DPRNNBaseJax:
    def __init__(self, input_dim, feature_dim, hidden_dim, output_dim,
                 num_spk=2, layer=4, segment_size=100):
        self.input_dim = input_dim
        self.feature_dim = feature_dim
        self.hidden_dim = hidden_dim
        self.output_dim = output_dim
        self.layer = layer
        self.segment_size = segment_size
        self.num_spk = num_spk
        self.eps = 1e-8

        # nn.Conv1d(input_dim, feature_dim, 1, bias=False) weight: (Cout, Cin, 1).
        wkey = jax.random.PRNGKey(42)
        bound = 1.0 / (input_dim ** 0.5)
        self.bn_weight = jax.random.uniform(
            wkey, (feature_dim, input_dim, 1), dtype=jnp.float32,
            minval=-bound, maxval=bound)
        # Pre-extract the (Cout, Cin) matmul form once (no per-forward transpose).
        # bf16 storage would halve HBM bytes on v6e/v7x; kept f32 for accuracy here.
        self.w_oc = self.bn_weight[:, :, 0]

    # ---- BN: 1x1 Conv1d, bias=False (computed in NCW, lane-dense over time) ----
    def BN(self, x):
        return _pallas_bn_ncw(x, self.w_oc)

    # ---- pad_segment ----
    def pad_segment(self, x, segment_size):
        B, D, L = x.shape
        stride = segment_size // 2
        rest = segment_size - (stride + L % segment_size) % segment_size
        if rest > 0:
            x = jnp.concatenate(
                [x, jnp.zeros((B, D, rest), dtype=x.dtype)], axis=2)
        pad_aux = jnp.zeros((B, D, stride), dtype=x.dtype)
        x = jnp.concatenate([pad_aux, x, pad_aux], axis=2)
        return x, rest

    # ---- split_feature ----
    def split_feature(self, x, segment_size):
        x, rest = self.pad_segment(x, segment_size)
        B, D, L = x.shape
        stride = segment_size // 2
        seg1 = x[:, :, :-stride].reshape(B, D, -1, segment_size)
        seg2 = x[:, :, stride:].reshape(B, D, -1, segment_size)
        segs = jnp.concatenate([seg1, seg2], axis=3).reshape(
            B, D, -1, segment_size)
        segs = jnp.transpose(segs, (0, 1, 3, 2))   # (B, D, segment_size, K)
        return segs, rest

    # ---- merge_feature (fused overlap-add in Pallas) ----
    def merge_feature(self, segs, rest):
        B, D, S, K = segs.shape
        stride = S // 2
        Kc = K // 2
        full_len = Kc * S
        out_len = full_len - stride - rest   # == original (uncropped) seq_len
        # De-interleave even/odd segments into two lane-dense time streams
        # (one strided-gather copy each); the shift + crop happen in the kernel.
        even = jnp.transpose(segs[:, :, :, 0::2], (0, 1, 3, 2)).reshape(B * D, full_len)
        odd = jnp.transpose(segs[:, :, :, 1::2], (0, 1, 3, 2)).reshape(B * D, full_len)
        out2d = _pallas_overlap_add(even, odd, stride=stride, out_len=out_len)
        return out2d.reshape(B, D, out_len)

    # ---- forward (base pipeline; DPRNN submodule replaced by identity) ----
    def forward(self, x):
        feat = self.BN(x)                                      # (B, feature_dim, L)
        segs, rest = self.split_feature(feat, self.segment_size)
        processed = segs  # TODO(synk): external DPRNN/DPRNN_TAC stack goes here.
        out = self.merge_feature(processed, rest)              # (B, feature_dim, L)
        return out


# ----------------------------------------------------------------------------
# Reference (pure JAX, PyTorch-equivalent math) to sanity check the Pallas paths
# ----------------------------------------------------------------------------
def _reference(model, x):
    w2d = model.bn_weight[:, :, 0]                             # (Cout, Cin)
    feat = jnp.einsum('oc,bcl->bol', w2d, x)
    segs, rest = model.split_feature(feat, model.segment_size)
    B, D, S, _ = segs.shape
    stride = S // 2
    y = jnp.transpose(segs, (0, 1, 3, 2)).reshape(B, D, -1, S * 2)
    in1 = y[:, :, :, :S].reshape(B, D, -1)[:, :, stride:]
    in2 = y[:, :, :, S:].reshape(B, D, -1)[:, :, :-stride]
    out = in1 + in2
    if rest > 0:
        out = out[:, :, :-rest]
    return out


if __name__ == "__main__":
    # Small, module-consistent shapes.
    batch, input_dim, feature_dim = 2, 16, 32
    hidden_dim, output_dim, seq_len, segment_size = 32, 16, 24, 8

    model = DPRNNBaseJax(input_dim, feature_dim, hidden_dim, output_dim,
                         num_spk=2, layer=4, segment_size=segment_size)

    key = jax.random.PRNGKey(0)
    x = jax.random.normal(key, (batch, input_dim, seq_len), dtype=jnp.float32)

    fwd = jax.jit(model.forward)
    out = fwd(x)
    out = jax.block_until_ready(out)

    ref = _reference(model, x)
    assert out.shape == (batch, feature_dim, seq_len), out.shape
    assert jnp.allclose(out, ref, atol=1e-4, rtol=1e-4), "mismatch vs reference"

    print("KERNEL_OK")
</pallas_src>

<mosaic_0001>
module attributes {stable_mosaic.version = 11 : i64} {
  func.func @_bn_conv1x1_kernel(%arg0: i32, %arg1: i32, %arg2: memref<1x16x24xf32, #tpu.memory_space<vmem>>, %arg3: memref<32x16xf32, #tpu.memory_space<vmem>>, %arg4: memref<1x32x24xf32, #tpu.memory_space<vmem>>) attributes {dimension_semantics = [#tpu.dimension_semantics<parallel>, #tpu.dimension_semantics<parallel>], iteration_bounds = array<i64: 2, 1>, scalar_prefetch = 0 : i64, scratch_operands = 0 : i64, tpu.core_type = #tpu.core_type<tc>, window_params = [{transform_indices = @transform_0, window_bounds = array<i64: 1, 16, 24>}, {pipeline_mode = #tpu.pipeline_mode<synchronous>, transform_indices = @transform_1, window_bounds = array<i64: 32, 16>}, {transform_indices = @transform_2, window_bounds = array<i64: 1, 32, 24>}]} {
    %c0 = arith.constant 0 : index
    %c0_0 = arith.constant 0 : index
    %0 = vector.load %arg3[%c0, %c0_0] : memref<32x16xf32, #tpu.memory_space<vmem>>, vector<32x16xf32>
    %c0_1 = arith.constant 0 : index
    %c0_2 = arith.constant 0 : index
    %c0_3 = arith.constant 0 : index
    %1 = vector.load %arg2[%c0_1, %c0_2, %c0_3] : memref<1x16x24xf32, #tpu.memory_space<vmem>>, vector<1x16x24xf32>
    %2 = vector.shape_cast %1 : vector<1x16x24xf32> to vector<16x24xf32>
    %cst = arith.constant dense<0.000000e+00> : vector<32x24xf32>
    %3 = tpu.matmul %0, %2, %cst {dimension_numbers = #tpu.dot_dimension_numbers<[1], [0], [0], [1], [0, 0, 1, 1], [], []>} : vector<32x16xf32>, vector<16x24xf32>, vector<32x24xf32> -> vector<32x24xf32>
    %c0_4 = arith.constant 0 : index
    %c0_5 = arith.constant 0 : index
    %c0_6 = arith.constant 0 : index
    %4 = vector.load %arg4[%c0_4, %c0_5, %c0_6] : memref<1x32x24xf32, #tpu.memory_space<vmem>>, vector<1x32x24xf32>
    %5 = vector.shape_cast %4 : vector<1x32x24xf32> to vector<32x24xf32>
    %6 = vector.shape_cast %3 : vector<32x24xf32> to vector<1x32x24xf32>
    tpu.vector_store %arg4[%c0_4, %c0_5, %c0_6], %6 {strides = array<i32>} : memref<1x32x24xf32, #tpu.memory_space<vmem>>, vector<1x32x24xf32>,
    return
  }
  func.func @transform_0(%arg0: i32, %arg1: i32) -> (i32, i32, i32) {
    %c0_i32 = arith.constant 0 : i32
    %c0_i32_0 = arith.constant 0 : i32
    return %arg0, %c0_i32, %arg1 : i32, i32, i32
  }
  func.func @transform_1(%arg0: i32, %arg1: i32) -> (i32, i32) {
    %c0_i32 = arith.constant 0 : i32
    %c0_i32_0 = arith.constant 0 : i32
    %c0_i32_1 = arith.constant 0 : i32
    return %c0_i32, %c0_i32_0 : i32, i32
  }
  func.func @transform_2(%arg0: i32, %arg1: i32) -> (i32, i32, i32) {
    %c0_i32 = arith.constant 0 : i32
    %c0_i32_0 = arith.constant 0 : i32
    return %arg0, %c0_i32, %arg1 : i32, i32, i32
  }
}

module attributes {stable_mosaic.version = 11 : i64} {
  func.func @_overlap_add_kernel(%arg0: i32, %arg1: memref<64x32xf32, #tpu.memory_space<vmem>>, %arg2: memref<64x32xf32, #tpu.memory_space<vmem>>, %arg3: memref<64x24xf32, #tpu.memory_space<vmem>>) attributes {dimension_semantics = [#tpu.dimension_semantics<parallel>], iteration_bounds = array<i64: 1>, scalar_prefetch = 0 : i64, scratch_operands = 0 : i64, tpu.core_type = #tpu.core_type<tc>, window_params = [{transform_indices = @transform_0, window_bounds = array<i64: 64, 32>}, {transform_indices = @transform_1, window_bounds = array<i64: 64, 32>}, {transform_indices = @transform_2, window_bounds = array<i64: 64, 24>}]} {
    %c0 = arith.constant 0 : index
    %c4 = arith.constant 4 : index
    %0 = vector.load %arg1[%c0, %c4] : memref<64x32xf32, #tpu.memory_space<vmem>>, vector<64x24xf32>
    %c0_0 = arith.constant 0 : index
    %c0_1 = arith.constant 0 : index
    %1 = vector.load %arg2[%c0_0, %c0_1] : memref<64x32xf32, #tpu.memory_space<vmem>>, vector<64x24xf32>
    %2 = arith.addf %0, %1 : vector<64x24xf32>
    %c0_2 = arith.constant 0 : index
    %c0_3 = arith.constant 0 : index
    %3 = vector.load %arg3[%c0_2, %c0_3] : memref<64x24xf32, #tpu.memory_space<vmem>>, vector<64x24xf32>
    tpu.vector_store %arg3[%c0_2, %c0_3], %2 {strides = array<i32>} : memref<64x24xf32, #tpu.memory_space<vmem>>, vector<64x24xf32>,
    return
  }
  func.func @transform_0(%arg0: i32) -> (i32, i32) {
    %c0_i32 = arith.constant 0 : i32
    %c0_i32_0 = arith.constant 0 : i32
    return %arg0, %c0_i32 : i32, i32
  }
  func.func @transform_1(%arg0: i32) -> (i32, i32) {
    %c0_i32 = arith.constant 0 : i32
    %c0_i32_0 = arith.constant 0 : i32
    return %arg0, %c0_i32 : i32, i32
  }
  func.func @transform_2(%arg0: i32) -> (i32, i32) {
    %c0_i32 = arith.constant 0 : i32
    %c0_i32_0 = arith.constant 0 : i32
    return %arg0, %c0_i32 : i32, i32
  }
}

</mosaic_0001>

<bundles_post_ra>
// kernel: forward.2
= control target key start
LH: loop header
LB: loop body
LE: loop exit
PB: predicated region body
PF: predicated region fallthrough
CT: control target
= control target key end

     0   :  { %7 = vsyncpa [#allocation3], 0  ;;  %s777_s0 = inlined_call_operand.hbm [shape: f32[2,16,24], index: 0, kind: input, shape index: {}]   ;;  %s778_s1 = inlined_call_operand.hbm [shape: f32[32,16], index: 1, kind: input, shape index: {}]   ;;  %s779_s2 = inlined_call_operand.vmem [shape: f32[2,32,24], index: 2, kind: output, shape index: {}]  }
   0x1   :  { %9 = vsyncpa [#allocation3 + $0x1], 0 }
   0x2   :  { %10 = vsyncpa [#allocation5], 0  ;;  %s650_s9 = smov 0   ;;  %s652_s10 = smov 0  }
   0x3   :  { %s654_s11 = smov 0   ;;  %s656_s12 = smov 0  }
   0x4   :  { %s658_s13 = smov 0   ;;  %s660_s14 = smov 0  }
   0x5 LB: > { %s412_s15 = sadd.s32 4294967295, %s629_s14   ;;  %p50_p0 = scmp.ne.s32.totalorder %s613_s10, %s609_s9  ;;  %s629_s14 = sphi %s660_s14, %s16_s14   ;;  %s625_s13 = sphi %s658_s13, %s789_s13   ;;  %s621_s12 = sphi %s656_s12, %s788_s12   ;;  %s617_s11 = sphi %s654_s11, %s787_s11   ;;  %s613_s10 = sphi %s652_s10, %s786_s10   ;;  %s609_s9 = sphi %s650_s9, %s785_s9  }
   0x6   : > { %p680_p1 = scmp.eq.s32.totalorder %s412_s15, 0  ;;  %p414_p2 = scmp.ge.s32.totalorder %s629_s14, 1 }
   0x7   : > { %p110_p3 = scmp.lt.s32.totalorder %s629_s14, 3  ;;  %s631_s19 = smov [#allocation4]  }
   0x8   : > { %p688_p4 = por %p680_p1, %p50_p0  ;;  %s122_s20 = sshll.u32 %s631_s19, 4  ;;  %s123_s20 = int_to_ptr.vmem [resolvable:$true] %s122_s20 }
   0x9   : > { %p692_p5 = pnand %p414_p2, %p110_p3  ;;  %s28_s22 = sadd.s32 1, %s625_s13 }
   0xa   : > { %s532_s23 = scalar_lea.vmem %s123_s20, 512  ;;  %p540_p12 = scmp.lt.s32.totalorder %s123_s20, %s123_s20 }
   0xb   : > { %p459_p6 = pneg %p692_p5  ;;  %p533_p9 = scmp.ne.s32.totalorder %s123_s20, %s532_s23 }
   0xc   : > { %p541_p13 = scmp.lt.s32.totalorder %s532_s23, %s532_s23 }
   0xd   : > { %p700_p7 = pnand %p459_p6, %p680_p1 }
   0xe   : > { %p542_p0 = por %p541_p13, %p540_p12 }
   0xf   : > { %p523_p8 = pneg %p700_p7 }
  0x11   : > { %p535_p10 = pnand %p533_p9, %p523_p8 }
  0x13   : > { %p536_p11 = pneg %p535_p10 }
  0x15   : > { %p543_p2 = pnand %p542_p0, %p536_p11 }
  0x17   : > { %546 = shalt.err (!%p543_p2)
}
  0x18   : > { %s632_s24 = smov 128   ;;  %s633_s25 = smov 8  }
  0x19   : > { %462 = dma.hbm_to_vmem [thread:$0]  (!%p700_p7), %s778_s1, 512, %s123_s20, [#allocation5], %s632_s24, %s632_s24, %s633_s25  }
  0x1a   : > { %p30_p3 = scmp.ge.s32.totalorder %s28_s22, 2  ;;  %s37_s28 = sadd.s32 1, %s617_s11 }
  0x1b   : > { %p44_p6 = scmp.ne.s32.totalorder %s617_s11, %s613_s10  ;;  %p45_p8 = scmp.eq.s32.totalorder %s629_s14, 0 }
  0x1c   : > { %s791_s22 = smov (%p30_p3, %s28_s22), 0  ;;  %p468_p10 = scmp.lt.s32.totalorder %s629_s14, 2 }
  0x1d   : > { %p46_p9 = por %p45_p8, %p44_p6  ;;  %s32_s29 = ssub.s32 %s625_s13, %s791_s22 }
  0x1e   : > { %s136_s30 = sand.u32 1, %s617_s11   ;;  %p35_p11 = scmp.eq.s32.totalorder %s32_s29, 0 }
  0x1f   : > { %s417_s3 = sshll.u32 %s136_s30, 4  ;;  %s431_s4 = sshll.u32 %s625_s13, 8 }
  0x20   : > { %s727_s5 = scalar_select %p35_p11, %s617_s11, %s37_s28  }
  0x21   : > { %s147_s8 = scalar_lea.hbm %s777_s0, %s431_s4  ;;  %s140_s9 = scalar_lea.vmem [#allocation2], %s417_s3 }
  0x22   : > { %s148_s15 = sshll.u32 %s140_s9, 4  ;;  %p732_p7 = pnand %p468_p10, %p46_p9  ;;  %s149_s15 = int_to_ptr.vmem [resolvable:$true] %s148_s15 }
  0x23   : > { %s137_s20 = scalar_lea.sflag [#allocation3], %s136_s30  ;;  %s560_s21 = scalar_lea.vmem %s149_s15, 256 }
  0x24   : > { %p549_p12 = pneg %p732_p7  ;;  %p561_p13 = scmp.ne.s32.totalorder %s149_s15, %s560_s21 }
  0x25   : > { %s634_s23 = smov [#allocation2]  }
  0x26   : > { %p563_p0 = pnand %p561_p13, %p549_p12  ;;  %s565_s26 = sshll.u32 %s634_s23, 4  ;;  %s566_s26 = int_to_ptr.vmem [resolvable:$false] %s565_s26 }
  0x27   : > { %s567_s27 = scalar_lea.vmem %s566_s26, 512  ;;  %p568_p3 = scmp.lt.s32.totalorder %s149_s15, %s566_s26 }
  0x28   : > { %p564_p2 = pneg %p563_p0  ;;  %p569_p6 = scmp.lt.s32.totalorder %s567_s27, %s560_s21 }
  0x2a   : > { %p570_p8 = por %p569_p6, %p568_p3 }
  0x2c   : > { %p571_p9 = pnand %p570_p8, %p564_p2 }
  0x2e   : > { %574 = shalt.err (!%p571_p9)
}
  0x2f   : > { %466 = dma.hbm_to_vmem [thread:$0]  (!%p732_p7), %s147_s8, 256, %s149_s15, %s137_s20, %s632_s24, %s632_s24, %s633_s25  }
  0x30   : > { %160 = sbr.rel (%p692_p5) target bundleno = 258 (0x102), region = 28  ;;  %s162_s28 = sand.u32 (!%p692_p5), 1, %s613_s10  }
  0x31   : > { %s421_s29 = sshll.u32 (!%p692_p5), %s162_s28, 4  ;;  %s163_s30 = scalar_lea.sflag (!%p692_p5), [#allocation3], %s162_s28 }
  0x32   : > { %s166_s3 = scalar_lea.vmem (!%p692_p5), [#allocation2], %s421_s29 }
  0x35   : > { %600 = dma.done.wait (%p688_p4), %s163_s30, 256  }
  0x36   : > { %602 = vsyncadd (%p688_p4), %s163_s30, 4294967040 }
  0x37   : > { %604 = dma.done.wait (%p680_p1), [#allocation5], 512  }
  0x38   : > { %606 = vsyncadd (%p680_p1), [#allocation5], 4294966784  ;;  %v207_v0 = vld [vmem:[%s166_s3 + $0x8] sm:$0xff]  ;;  %v206_v1 = vld [vmem:[%s166_s3] sm:$0xff]  ;;  %vm208_vm0 = vcmask 130048   ;;  %p194_p1 = scmp.lt.s32.totalorder %s621_s12, 1 }
  0x39   : > { %439 = vmatprep.subr.mxu0 %v207_v0  ;;  %449 = vmatprep.subr.mxu1 %v207_v0  ;;  %v202_v2 = vld [vmem:[#allocation4] sm:$0xff]  ;;  %v204_v3 = vld [vmem:[#allocation4 + $0x10] sm:$0xff]  ;;  %v203_v4 = vld [vmem:[#allocation4 + $0x8] sm:$0xff]  ;;  %vm306_vm1 = vcmask 195584  }
  0x3a   : > { %440 = vmatpush3.msra.mxu0 %v207_v0  ;;  %451 = vmatpush3.msra.mxu1 %v207_v0  ;;  %v205_v5 = vld [vmem:[#allocation4 + $0x18] sm:$0xff]  ;;  %s793_s12 = smov (!%p194_p1, %s621_s12), 1 }
  0x3b   : > { %441 = vmatprep.subr.mxu0 %v206_v1  ;;  %450 = vmatprep.subr.mxu1 %v206_v1  ;;  %s432_s16 = sshll.u32 %s793_s12, 5 }
  0x3c   : > { %442 = vmatpush3.msra.mxu0 %v206_v1  ;;  %452 = vmatpush3.msra.mxu1 %v206_v1  ;;  %s201_s24 = scalar_lea.vmem %s779_s2, %s432_s16 }
  0x3d   : > { %443 = vmatprep.mubr.msk.f32.mxu0 %vm208_vm0, %v202_v2  ;;  %446 = vmatprep.mubr.msk.f32.mxu1 %vm208_vm0, %v204_v3 }
  0x3e   : > { %444 = vmatmul.mubr.msk.f32.vlgmr.msra.gmra.mxu0 %vm208_vm0, %v203_v4  ;;  %447 = vmatmul.mubr.msk.f32.vlgmr.msra.gmra.mxu1 %vm208_vm0, %v205_v5 }
  0xfe   : > { %v445_v6 = vpop.f32.mrf.mxu0  ;;  %v448_v7 = vpop.f32.mrf.mxu1 }
  0xff   : > { %308 = vst.msk [vmem:[%s201_s24 + $0x8] sm:$0xff] %vm306_vm1, %v445_v6  ;;  %310 = vst.msk [vmem:[%s201_s24 + $0x18] sm:$0xff] %vm306_vm1, %v448_v7 }
 0x100   : > { %v287_v8 = vpop.f32.mrf.mxu0  ;;  %v297_v9 = vpop.f32.mrf.mxu1 }
 0x101   : > { %307 = vst.msk [vmem:[%s201_s24] sm:$0xff] %vm306_vm1, %v287_v8  ;;  %309 = vst.msk [vmem:[%s201_s24 + $0x10] sm:$0xff] %vm306_vm1, %v297_v9 }
 0x102 PF: > { %s16_s14 = sadd.s32 1, %s629_s14   ;;  %s785_s9 = smov %s613_s10 }
 0x103   : > { %p13_p4 = scmp.ge.s32.totalorder %s16_s14, 4   ;;  %s786_s10 = smov %s617_s11 }
 0x104   : > { %s787_s11 = smov %s727_s5  ;;  %s788_s12 = smov %s625_s13 }
 0x105   : > { %s789_s13 = smov %s791_s22  ;;  %15 = sbr.rel (!%p13_p4) target bundleno = 5 (0x5), region = 72 }
 0x10a   :  { %338 = vsyncpa [#allocation3], 1 }
 0x10b   :  { %340 = vsyncpa [#allocation3 + $0x1], 1 }
 0x10c   :  { %341 = vsyncpa [#allocation5], 1 }

// kernel: forward.3
= control target key start
LH: loop header
LB: loop body
LE: loop exit
PB: predicated region body
PF: predicated region fallthrough
CT: control target
= control target key end

     0   :  { %s114_s13 = smov 4   ;;  %s115_s4 = smov 124   ;;  %vm99_vm0 = vcmask 195584   ;;  %s211_s1 = inlined_call_operand.vmem [shape: f32[64,32], index: 1, kind: input, shape index: {}]   ;;  %s212_s0 = inlined_call_operand.vmem [shape: f32[64,32], index: 0, kind: input, shape index: {}]   ;;  %s213_s2 = inlined_call_operand.vmem [shape: f32[64,24], index: 2, kind: output, shape index: {}]  }
   0x1   :  { %v19_v0 = vld [vmem:[%s211_s1] sm:$0xff]  ;;  %v21_v1 = vld [vmem:[%s211_s1 + $0x10] sm:$0xff]  ;;  %v20_v2 = vld [vmem:[%s211_s1 + $0x8] sm:$0xff] }
   0x2   :  { %35 = vrot.lane.b32.xlu0 %v19_v0, %s114_s13  ;;  %39 = vrot.lane.b32.xlu1 %v21_v1, %s114_s13  ;;  %v22_v3 = vld [vmem:[%s211_s1 + $0x18] sm:$0xff]  ;;  %v24_v4 = vld [vmem:[%s211_s1 + $0x28] sm:$0xff] }
   0x3   :  { %v23_v5 = vld [vmem:[%s211_s1 + $0x20] sm:$0xff]  ;;  %v26_v6 = vld [vmem:[%s211_s1 + $0x38] sm:$0xff]  ;;  %v25_v7 = vld [vmem:[%s211_s1 + $0x30] sm:$0xff] }
   0x4   :  { %v11_v8 = vld [vmem:[%s212_s0] sm:$0xff]  ;;  %v13_v11 = vld [vmem:[%s212_s0 + $0x10] sm:$0xff]  ;;  %v12_v13 = vld [vmem:[%s212_s0 + $0x8] sm:$0xff] }
   0x5   :  { %v14_v17 = vld [vmem:[%s212_s0 + $0x18] sm:$0xff]  ;;  %v15_v19 = vld [vmem:[%s212_s0 + $0x20] sm:$0xff]  ;;  %v16_v22 = vld [vmem:[%s212_s0 + $0x28] sm:$0xff] }
   0x6   :  { %37 = vrot.lane.b32.xlu0 %v20_v2, %s114_s13  ;;  %41 = vrot.lane.b32.xlu1 %v22_v3, %s114_s13  ;;  %v17_v25 = vld [vmem:[%s212_s0 + $0x30] sm:$0xff]  ;;  %v18_v28 = vld [vmem:[%s212_s0 + $0x38] sm:$0xff] }
   0xa   :  { %45 = vrot.lane.b32.xlu1 %v24_v4, %s114_s13  ;;  %43 = vrot.lane.b32.xlu0 %v23_v5, %s114_s13 }
   0xe   :  { %49 = vrot.lane.b32.xlu1 %v26_v6, %s114_s13  ;;  %47 = vrot.lane.b32.xlu0 %v25_v7, %s114_s13 }
  0x74   :  { %v36_v9 = vpop.permute.xlu0 %35  ;;  %v40_v10 = vpop.permute.xlu1 %39 }
  0x75   :  { %v59_v12 = vadd.f32 %v36_v9, %v11_v8  ;;  %v61_v14 = vadd.f32 %v40_v10, %v13_v11 }
  0x77   :  { %75 = vrot.lane.b32.xlu0 %v59_v12, %s115_s4 }
  0x78   :  { %v38_v15 = vpop.permute.xlu0 %37  ;;  %v42_v16 = vpop.permute.xlu1 %41 }
  0x79   :  { %v60_v18 = vadd.f32 %v38_v15, %v12_v13  ;;  %v62_v20 = vadd.f32 %v42_v16, %v14_v17 }
  0x7b   :  { %77 = vrot.lane.b32.xlu1 %v60_v18, %s115_s4  ;;  %79 = vrot.lane.b32.xlu0 %v61_v14, %s115_s4 }
  0x7c   :  { %v46_v21 = vpop.permute.xlu1 %45  ;;  %v44_v23 = vpop.permute.xlu0 %43 }
  0x7d   :  { %v63_v24 = vadd.f32 %v44_v23, %v15_v19  ;;  %v64_v26 = vadd.f32 %v46_v21, %v16_v22 }
  0x7f   :  { %81 = vrot.lane.b32.xlu1 %v62_v20, %s115_s4  ;;  %83 = vrot.lane.b32.xlu0 %v63_v24, %s115_s4 }
  0x80   :  { %v50_v27 = vpop.permute.xlu1 %49  ;;  %v48_v29 = vpop.permute.xlu0 %47 }
  0x81   :  { %v65_v30 = vadd.f32 %v48_v29, %v17_v25  ;;  %v66_v31 = vadd.f32 %v50_v27, %v18_v28 }
  0x83   :  { %85 = vrot.lane.b32.xlu1 %v64_v26, %s115_s4  ;;  %87 = vrot.lane.b32.xlu0 %v65_v30, %s115_s4 }
  0x87   :  { %89 = vrot.lane.b32.xlu1 %v66_v31, %s115_s4 }
  0xe9   :  { %v76_v32 = vpop.permute.xlu0 %75 }
  0xea   :  { %100 = vst.msk [vmem:[%s213_s2] sm:$0xff] %vm99_vm0, %v76_v32 }
  0xed   :  { %v78_v33 = vpop.permute.xlu1 %77  ;;  %v80_v34 = vpop.permute.xlu0 %79 }
  0xee   :  { %101 = vst.msk [vmem:[%s213_s2 + $0x8] sm:$0xff] %vm99_vm0, %v78_v33  ;;  %102 = vst.msk [vmem:[%s213_s2 + $0x10] sm:$0xff] %vm99_vm0, %v80_v34 }
  0xf1   :  { %v82_v35 = vpop.permute.xlu1 %81  ;;  %v84_v36 = vpop.permute.xlu0 %83 }
  0xf2   :  { %103 = vst.msk [vmem:[%s213_s2 + $0x18] sm:$0xff] %vm99_vm0, %v82_v35  ;;  %104 = vst.msk [vmem:[%s213_s2 + $0x20] sm:$0xff] %vm99_vm0, %v84_v36 }
  0xf5   :  { %v86_v37 = vpop.permute.xlu1 %85  ;;  %v88_v38 = vpop.permute.xlu0 %87 }
  0xf6   :  { %105 = vst.msk [vmem:[%s213_s2 + $0x28] sm:$0xff] %vm99_vm0, %v86_v37  ;;  %106 = vst.msk [vmem:[%s213_s2 + $0x30] sm:$0xff] %vm99_vm0, %v88_v38 }
  0xf9   :  { %v90_v39 = vpop.permute.xlu1 %89 }
  0xfa   :  { %107 = vst.msk [vmem:[%s213_s2 + $0x38] sm:$0xff] %vm99_vm0, %v90_v39 }

</bundles_post_ra>
